<compile_context>
chip_gen: v6e
topology: v6e:2x2x1
jax: 0.10.0
libtpu: 0.0.40
codegen_flags: <defaults>
</compile_context>

<pallas_src>
import jax
import jax.numpy as jnp
from jax import lax
from jax.experimental import pallas as pl
from jax.experimental.pallas import tpu as pltpu


# ------------------- standalone h_sigmoid (the spec module) ------------------
def h_sigmoid_kernel(x_ref, o_ref):
    x = x_ref[...]
    # h_sigmoid(x) = relu6(x + 3) / 6
    o_ref[...] = (jnp.clip(x + 3.0, 0.0, 6.0) * (1.0 / 6.0)).astype(o_ref.dtype)


def h_sigmoid_pallas(x, tile_rows=2048):
    """Elementwise h_sigmoid = relu6(x + 3) / 6 on TPU.

    No pad/concat/slice in the wrapper (each was an extra HBM read+write pass):
    a free contiguous reshape exposes a lane-dense (rows, 128) slab when
    possible, otherwise the native last dim is kept (full-dim block satisfies
    the (8,128) layout rule).  A row-tiled "parallel" grid gives DMA/compute
    overlap and megacore use on v7x; the ragged last tile is masked by Pallas.
    """
    orig_shape = x.shape
    n = x.size
    if n == 0:
        return x
    LANES = 128
    if n % LANES == 0:
        slab = x.reshape(n // LANES, LANES)          # free reshape (contiguous)
    elif x.ndim >= 2:
        slab = x.reshape(-1, orig_shape[-1])         # keep native last dim
    else:
        slab = x.reshape(1, -1)
    rows, cols = slab.shape

    tile_rows = max(8, (tile_rows // 8) * 8)         # keep sublane divisibility
    block_rows = rows if rows <= tile_rows else tile_rows
    grid = (pl.cdiv(rows, block_rows),)
    itemsize = jnp.dtype(x.dtype).itemsize

    out = pl.pallas_call(
        h_sigmoid_kernel,
        out_shape=jax.ShapeDtypeStruct((rows, cols), x.dtype),
        grid=grid,
        in_specs=[pl.BlockSpec((block_rows, cols), lambda i: (i, 0))],
        out_specs=pl.BlockSpec((block_rows, cols), lambda i: (i, 0)),
        compiler_params=pltpu.CompilerParams(
            dimension_semantics=("parallel",),
            vmem_limit_bytes=32 * 1024 * 1024,
        ),
        cost_estimate=pl.CostEstimate(
            flops=3 * n, transcendentals=0, bytes_accessed=2 * n * itemsize),
    )(slab)
    return out.reshape(orig_shape)


# -------------------- context-injection fusion (uses h_sigmoid) --------------
def fusion_kernel(xc_ref, xf_ref, mT_ref, wfT_ref, bfT_ref, waeT_ref, baeT_ref,
                  o_ref):
    E = o_ref.shape[0]

    # Fused task_act | task_embed 1x1 convs over the whole (small, resident)
    # context: [2E, B*N].  Recomputed per lane-tile so every grid step is
    # independent -> safe with "parallel" semantics / megacore; the context
    # matmul is tiny next to the per-tile upsample + fea_embed work.
    t = jnp.dot(waeT_ref[...], xc_ref[...],
                preferred_element_type=jnp.float32) + baeT_ref[...]
    hs = jnp.clip(t + 3.0, 0.0, 6.0) * (1.0 / 6.0)     # h_sigmoid, f32 epilogue
    row = lax.broadcasted_iota(jnp.int32, t.shape, 0)
    st = jnp.where(row < E, hs, t)                     # act rows get h_sigmoid

    # back_feature = fea_embed(x_f)   (channel-major tile: [E, TP])
    back = jnp.dot(wfT_ref[...], xf_ref[...],
                   preferred_element_type=jnp.float32) + bfT_ref[...]

    # single shared bilinear upsample of both halves: [2E, TP]
    u = jnp.dot(st.astype(mT_ref.dtype), mT_ref[...],
                preferred_element_type=jnp.float32)

    # fusion_out = back_feature * up(h_sigmoid(task_act)) + up(task_embed)
    o_ref[...] = (back * u[:E, :] + u[E:, :]).astype(o_ref.dtype)


def context_inject_fusion(x_c, x_f_nchw, M, wf, bf, wa, ba, we, be,
                          matmul_dtype=jnp.bfloat16, tile_p=512):
    """x_c: [B,N,Ct] tokens; x_f_nchw: [B,Cf,Hf,Wf]; M: [Pf,N]; weights [Cin,E],
    biases [1,E].  Returns [B, Pf, E] (channels-last), matching PyTorch."""
    B, N, Ct = x_c.shape
    _, Cf, Hf, Wf = x_f_nchw.shape
    Pf = Hf * Wf
    E = wf.shape[1]
    BN = B * N
    BPf = B * Pf

    # Fold the batch onto the lane axis (channel-major): the kernel writes
    # lane-dense [E, B*Pf] blocks (no 64-lane masked stores, no per-b loop).
    xcT = jnp.transpose(x_c, (2, 0, 1)).reshape(Ct, BN)                 # [Ct, B*N]
    xfT = jnp.transpose(x_f_nchw.reshape(B, Cf, Pf), (1, 0, 2)).reshape(Cf, BPf)
    mT = jnp.kron(jnp.eye(B, dtype=M.dtype), M).T                       # [B*N, B*Pf]
    # TODO(synk): at large B/Pf the block-diagonal kron wastes MXU work/VMEM;
    # switch to a (B, Pf-tile) grid with a separable Mh/Mw upsample instead.
    wfT = wf.T                                                          # [E, Cf]
    bfT = bf.reshape(E, 1).astype(jnp.float32)
    waeT = jnp.concatenate([wa, we], axis=1).T                          # [2E, Ct]
    baeT = jnp.concatenate([ba, be], axis=1).reshape(2 * E, 1).astype(jnp.float32)

    if matmul_dtype is not None:   # bf16 MXU operands (v5e/v6e/v7x); f32 acc + epilogue
        xcT = xcT.astype(matmul_dtype)
        xfT = xfT.astype(matmul_dtype)
        mT = mT.astype(matmul_dtype)
        wfT = wfT.astype(matmul_dtype)
        waeT = waeT.astype(matmul_dtype)

    if BPf <= tile_p:
        TP = BPf                           # full dim (any width is legal)
    else:
        TP = max(128, (tile_p // 128) * 128)   # lane-dense tile, ragged tail masked
    n_tiles = pl.cdiv(BPf, TP)

    flops = int(2 * (2 * E) * Ct * BN * n_tiles       # fused act|embed convs
                + 2 * E * Cf * BPf                    # fea_embed
                + 2 * (2 * E) * BN * BPf              # shared upsample
                + 8 * (2 * E) * BN + 3 * E * BPf)     # elementwise epilogue
    bytes_accessed = int(xcT.nbytes * n_tiles + xfT.nbytes + mT.nbytes
                         + wfT.nbytes + bfT.nbytes + waeT.nbytes + baeT.nbytes
                         + E * BPf * 4)

    out_t = pl.pallas_call(
        fusion_kernel,
        out_shape=jax.ShapeDtypeStruct((E, BPf), jnp.float32),
        grid=(n_tiles,),
        in_specs=[
            pl.BlockSpec((Ct, BN), lambda j: (0, 0)),       # context, resident
            pl.BlockSpec((Cf, TP), lambda j: (0, j)),       # x_f lane-tile
            pl.BlockSpec((BN, TP), lambda j: (0, j)),       # interp-matrix tile
            pl.BlockSpec((E, Cf), lambda j: (0, 0)),        # fea_embed weight
            pl.BlockSpec((E, 1), lambda j: (0, 0)),         # fea_embed bias
            pl.BlockSpec((2 * E, Ct), lambda j: (0, 0)),    # act|embed weight
            pl.BlockSpec((2 * E, 1), lambda j: (0, 0)),     # act|embed bias
        ],
        out_specs=pl.BlockSpec((E, TP), lambda j: (0, j)),
        compiler_params=pltpu.CompilerParams(
            dimension_semantics=("parallel",),
            vmem_limit_bytes=32 * 1024 * 1024,
        ),
        cost_estimate=pl.CostEstimate(
            flops=flops, transcendentals=0, bytes_accessed=bytes_accessed),
    )(xcT, xfT, mT, wfT, bfT, waeT, baeT)

    # [E, B*Pf] channel-major inside the kernel -> [B, Pf, E] outside (layout
    # plumbing; drop this transpose if the consumer accepts channel-major).
    return jnp.transpose(out_t.reshape(E, B, Pf), (1, 2, 0))


# ------------------------------ JAX glue -------------------------------------
def interp_matrix_1d(src, dst):
    """PyTorch bilinear, align_corners=False: 1-D interpolation matrix [dst, src]."""
    scale = src / dst
    d = jnp.arange(dst, dtype=jnp.float32)
    s = (d + 0.5) * scale - 0.5
    s = jnp.maximum(s, 0.0)                      # PyTorch clamps negative src coords
    i0 = jnp.floor(s).astype(jnp.int32)
    i0 = jnp.minimum(i0, src - 1)
    i1 = jnp.minimum(i0 + 1, src - 1)
    frac = s - i0.astype(jnp.float32)
    Mmat = jnp.zeros((dst, src), dtype=jnp.float32)
    rows = jnp.arange(dst)
    Mmat = Mmat.at[rows, i0].add(1.0 - frac)
    Mmat = Mmat.at[rows, i1].add(frac)
    return Mmat


def fold_conv_bn(key, c_in, c_out, eps=1e-5):
    """Deterministic conv1x1 + BatchNorm2d (eval) params folded into W [c_in,c_out], b [1,c_out]."""
    k1, k2, k3, k4, k5, k6 = jax.random.split(key, 6)
    w = jax.random.normal(k1, (c_in, c_out), jnp.float32) * 0.1
    b = jax.random.normal(k2, (c_out,), jnp.float32) * 0.1
    gamma = 1.0 + 0.1 * jax.random.normal(k3, (c_out,), jnp.float32)
    beta = 0.1 * jax.random.normal(k4, (c_out,), jnp.float32)
    mean = 0.1 * jax.random.normal(k5, (c_out,), jnp.float32)
    var = jnp.abs(jax.random.normal(k6, (c_out,), jnp.float32)) + 0.5
    scale = gamma / jnp.sqrt(var + eps)
    w_f = w * scale[None, :]
    b_f = (b - mean) * scale + beta
    return w_f, b_f[None, :]


if __name__ == "__main__":
    B = 2
    C_task = 32           # task context channels
    H = W = 4             # task context spatial (N = H*W)
    N = H * W
    C_fea = 16            # backbone feature channels
    Hf = Wf = 8           # backbone spatial
    Pf = Hf * Wf
    reduction = 2
    E = C_task // reduction   # embed channels = 16

    key = jax.random.PRNGKey(0)
    k_hs, k_hs2, k_xc, k_xf, k_fe, k_ta, k_te = jax.random.split(key, 7)

    # --- 1) the literal spec module: standalone h_sigmoid --------------------
    x = jax.random.normal(k_hs, (B, 4, 16, 16), jnp.float32) * 3.0
    y = jax.block_until_ready(h_sigmoid_pallas(x))
    y_ref = jnp.clip(x + 3.0, 0.0, 6.0) / 6.0
    assert y.shape == x.shape
    assert jnp.max(jnp.abs(y - y_ref)) < 1e-5

    # exercise the multi-tile grid with a ragged (masked) last block
    x2 = jax.random.normal(k_hs2, (2056, 128), jnp.float32) * 3.0
    y2 = jax.block_until_ready(h_sigmoid_pallas(x2))
    y2_ref = jnp.clip(x2 + 3.0, 0.0, 6.0) / 6.0
    assert jnp.max(jnp.abs(y2 - y2_ref)) < 1e-5

    # --- 2) the context-injection fusion block that uses h_sigmoid -----------
    x_c = jax.random.normal(k_xc, (B, N, C_task), jnp.float32)
    x_f_nchw = jax.random.normal(k_xf, (B, C_fea, Hf, Wf), jnp.float32)

    wf, bf = fold_conv_bn(k_fe, C_fea, E)    # fea_embed  (folded conv1x1 + BN)
    wa, ba = fold_conv_bn(k_ta, C_task, E)   # task_act
    we, be = fold_conv_bn(k_te, C_task, E)   # task_embed

    Mh = interp_matrix_1d(H, Hf)             # [Hf, H]
    Mw = interp_matrix_1d(W, Wf)             # [Wf, W]
    M = jnp.kron(Mh, Mw)                     # [Pf, N]  bilinear (align_corners=False)

    # plain-JAX f32 reference of the same math
    x_f_flat = jnp.transpose(x_f_nchw.reshape(B, C_fea, Pf), (0, 2, 1))
    back_ref = x_f_flat @ wf + bf
    ta_ref = x_c @ wa + ba
    sig_ref = jnp.clip(ta_ref + 3.0, 0.0, 6.0) / 6.0
    te_ref = x_c @ we + be
    ref = back_ref * jnp.einsum('pn,bne->bpe', M, sig_ref) \
        + jnp.einsum('pn,bne->bpe', M, te_ref)

    # exact-math validation (f32 MXU operands)
    out_f32 = jax.block_until_ready(
        context_inject_fusion(x_c, x_f_nchw, M, wf, bf, wa, ba, we, be,
                              matmul_dtype=None))
    assert out_f32.shape == (B, Pf, E)
    assert jnp.max(jnp.abs(out_f32 - ref)) < 1e-4

    # perf default: bf16 MXU operands, f32 accumulation + f32 epilogue
    out_bf16 = jax.block_until_ready(
        context_inject_fusion(x_c, x_f_nchw, M, wf, bf, wa, ba, we, be))
    assert out_bf16.shape == (B, Pf, E)
    assert jnp.max(jnp.abs(out_bf16 - ref)) < 6e-2

    print("KERNEL_OK")
</pallas_src>

<mosaic_0001>
module attributes {stable_mosaic.version = 11 : i64} {
  func.func @h_sigmoid_kernel(%arg0: i32, %arg1: memref<16x128xf32, #tpu.memory_space<vmem>>, %arg2: memref<16x128xf32, #tpu.memory_space<vmem>>) attributes {dimension_semantics = [#tpu.dimension_semantics<parallel>], iteration_bounds = array<i64: 1>, scalar_prefetch = 0 : i64, scratch_operands = 0 : i64, tpu.core_type = #tpu.core_type<tc>, window_params = [{transform_indices = @transform_0, window_bounds = array<i64: 16, 128>}, {transform_indices = @transform_1, window_bounds = array<i64: 16, 128>}]} {
    %c0 = arith.constant 0 : index
    %c0_0 = arith.constant 0 : index
    %0 = vector.load %arg1[%c0, %c0_0] : memref<16x128xf32, #tpu.memory_space<vmem>>, vector<16x128xf32>
    %cst = arith.constant 3.000000e+00 : f32
    %1 = vector.broadcast %cst : f32 to vector<16x128xf32>
    %2 = arith.addf %0, %1 : vector<16x128xf32>
    %cst_1 = arith.constant 0.000000e+00 : f32
    %cst_2 = arith.constant 6.000000e+00 : f32
    %3 = vector.broadcast %cst_1 : f32 to vector<16x128xf32>
    %4 = arith.maximumf %3, %2 : vector<16x128xf32>
    %5 = vector.broadcast %cst_2 : f32 to vector<16x128xf32>
    %6 = arith.minimumf %5, %4 : vector<16x128xf32>
    %cst_3 = arith.constant 0.166666672 : f32
    %7 = vector.broadcast %cst_3 : f32 to vector<16x128xf32>
    %8 = arith.mulf %6, %7 : vector<16x128xf32>
    %c0_4 = arith.constant 0 : index
    %c0_5 = arith.constant 0 : index
    %9 = vector.load %arg2[%c0_4, %c0_5] : memref<16x128xf32, #tpu.memory_space<vmem>>, vector<16x128xf32>
    tpu.vector_store %arg2[%c0_4, %c0_5], %8 {strides = array<i32>} : memref<16x128xf32, #tpu.memory_space<vmem>>, vector<16x128xf32>,
    return
  }
  func.func @transform_0(%arg0: i32) -> (i32, i32) {
    %c0_i32 = arith.constant 0 : i32
    %c0_i32_0 = arith.constant 0 : i32
    return %arg0, %c0_i32 : i32, i32
  }
  func.func @transform_1(%arg0: i32) -> (i32, i32) {
    %c0_i32 = arith.constant 0 : i32
    %c0_i32_0 = arith.constant 0 : i32
    return %arg0, %c0_i32 : i32, i32
  }
}

</mosaic_0001>

<bundles_post_ra>
// kernel: tpu_custom_call.1
= control target key start
LH: loop header
LB: loop body
LE: loop exit
PB: predicated region body
PF: predicated region fallthrough
CT: control target
= control target key end

     0   :  { %6 = vsyncpa [#allocation3], 0  ;;  %s126_s0 = inlined_call_operand.hbm [shape: f32[16,128], index: 0, kind: input, shape index: {}]   ;;  %s127_s1 = inlined_call_operand.hbm [shape: f32[16,128], index: 1, kind: output, shape index: {}]  }
   0x1   :  { %7 = vsyncpa [#allocation4], 0  ;;  %s100_s6 = smov [#allocation2]  }
   0x2   :  { %s13_s7 = sshll.u32 %s100_s6, 4  ;;  %s14_s7 = int_to_ptr.vmem [resolvable:$true] %s13_s7 }
   0x3   :  { %s64_s8 = scalar_lea.vmem %s14_s7, 256  ;;  %p69_p1 = scmp.lt.s32.totalorder %s14_s7, %s14_s7 }
   0x4   :  { %p65_p0 = scmp.ne.s32.totalorder %s14_s7, %s64_s8  ;;  %p70_p2 = scmp.lt.s32.totalorder %s64_s8, %s64_s8 }
   0x6   :  { %p71_p3 = por %p70_p2, %p69_p1 }
   0x8   :  { %p72_p4 = pnand %p71_p3, %p65_p0 }
   0xa   :  { %75 = shalt.err (!%p72_p4)
}
   0xb   :  { %s101_s9 = smov 128   ;;  %s102_s10 = smov 8  }
   0xc   :  { %19 = dma.hbm_to_vmem [thread:$0]  %s126_s0, 256, %s14_s7, [#allocation3], %s101_s9, %s101_s9, %s102_s10  }
   0xd   :  { %96 = dma.done.wait [#allocation3], 256  }
   0xe   :  { %97 = vsyncadd [#allocation3], 4294967040  ;;  %v23_v0 = vld [vmem:[#allocation2] sm:$0xff]  ;;  %v24_v1 = vld [vmem:[#allocation2 + $0x8] sm:$0xff]  ;;  %s103_s13 = smov [#allocation5]  }
   0xf   :  { %v25_v2 = vadd.f32 3.0, %v23_v0  ;;  %v26_v3 = vadd.f32 3.0, %v24_v1  ;;  %s40_s14 = sshll.u32 %s103_s13, 4  ;;  %s41_s14 = int_to_ptr.vmem [resolvable:$true] %s40_s14 }
  0x10   :  { %s76_s15 = scalar_lea.vmem %s41_s14, 256  ;;  %p81_p6 = scmp.lt.s32.totalorder %s41_s14, %s41_s14 }
  0x11   :  { %v27_v4 = vmax.f32 %v25_v2, 0.0  ;;  %v28_v5 = vmax.f32 %v26_v3, 0.0  ;;  %p77_p5 = scmp.ne.s32.totalorder %s41_s14, %s76_s15  ;;  %p82_p7 = scmp.lt.s32.totalorder %s76_s15, %s76_s15 }
  0x13   :  { %v29_v6 = vmin.f32 %v27_v4, 6.0  ;;  %v30_v7 = vmin.f32 %v28_v5, 6.0  ;;  %p83_p8 = por %p82_p7, %p81_p6 }
  0x15   :  { %v31_v8 = vmul.f32 0.16666667, %v29_v6  ;;  %v32_v9 = vmul.f32 0.16666667, %v30_v7  ;;  %p84_p9 = pnand %p83_p8, %p77_p5 }
  0x17   :  { %33 = vst [vmem:[#allocation5] sm:$0xff] %v31_v8  ;;  %34 = vst [vmem:[#allocation5 + $0x8] sm:$0xff] %v32_v9 }
  0x18   :  { %87 = shalt.err (!%p84_p9)
}
  0x19   :  { %46 = dma.vmem_to_hbm [thread:$0]  %s41_s14, 256, %s127_s1, [#allocation4], %s101_s9, %s101_s9, %s102_s10  }
  0x1a   :  { %98 = dma.done.wait [#allocation4], 256  }
  0x1b   :  { %99 = vsyncadd [#allocation4], 4294967040 }
  0x1c   :  { %50 = vsyncpa [#allocation3], 1 }
  0x1d   :  { %51 = vsyncpa [#allocation4], 1 }

</bundles_post_ra>
